<compile_context>
chip_gen: v7x
topology: tpu7x:2x2x1
jax: 0.10.0
libtpu: 0.0.40
codegen_flags: <defaults>
</compile_context>

<pallas_src>
import jax
import jax.numpy as jnp
from jax import lax
from jax.experimental import pallas as pl
from jax.experimental.pallas import tpu as pltpu


def _fused_kernel(p_ref, w_ref, b_ref, o_ref):
    # p_ref: (K, N*HW)        im2col patches, batch folded into lanes
    # w_ref: (O_total, K)     zero-embedded, unclamped weights (all branches)
    # b_ref: (O_total, 1)     biases (all branches)
    # o_ref: (O_total, N*HW)  lane-dense output
    wc = jnp.clip(w_ref[...], -1.0, 1.0)            # ConstrainedConv2d clamp (once/call)
    acc = jnp.dot(wc, p_ref[...],                   # (O,K) x (K, N*HW) on the MXU
                  preferred_element_type=jnp.float32)
    o_ref[...] = (acc + b_ref[...]).astype(o_ref.dtype)


def _embed_weights(params, C, KH, KW):
    """Zero-embed each branch's (O_b, C, kh, kw) weight into (O_b, C, KH, KW),
    stack along output channels, and flatten to the im2col layout."""
    w_blocks, b_blocks = [], []
    for w, b in params:
        O_b, C_b, kh, kw = w.shape
        assert C_b == C
        assert kh % 2 == 1 and kw % 2 == 1, "only odd kernels supported"
        oh, ow = (KH - kh) // 2, (KW - kw) // 2
        w_full = jnp.zeros((O_b, C, KH, KW), w.dtype)
        w_full = w_full.at[:, :, oh:oh + kh, ow:ow + kw].set(w)
        w_blocks.append(w_full)
        b_blocks.append(b)
    w_all = jnp.concatenate(w_blocks, axis=0)               # (O_total, C, KH, KW)
    b_all = jnp.concatenate(b_blocks, axis=0)               # (O_total,)
    O_total = w_all.shape[0]
    # column index = c*KH*KW + dh*KW + dw  (must match patch row ordering)
    return w_all.reshape(O_total, C * KH * KW), b_all.reshape(O_total, 1)


def ted_conv2d(x, params):
    """Ted_Conv2d forward.

    x:      (N, C, H, W) float32
    params: list of (w, b) with w: (O_b, C, kh, kw), b: (O_b,)
    returns (N, sum(O_b), H, W) float32
    """
    N, C, H, W = x.shape
    KH = max(w.shape[2] for w, _ in params)
    KW = max(w.shape[3] for w, _ in params)
    ph, pw = (KH - 1) // 2, (KW - 1) // 2
    HW = H * W
    NHW = N * HW
    K = C * KH * KW

    w_mat, b_mat = _embed_weights(params, C, KH, KW)        # (O_total, K), (O_total, 1)
    O_total = w_mat.shape[0]

    # Reflect pad once with the max-kernel halo (requires H, W >= ph+1).
    if ph or pw:
        xpad = jnp.pad(x, ((0, 0), (0, 0), (ph, ph), (pw, pw)), mode="reflect")
    else:
        xpad = x

    # Wrapper-side im2col with batch folded into the lane axis:
    #   patches[c*KH*KW + dh*KW + dw, n*HW + h*W + w] = xpad[n, c, h+dh, w+dw]
    taps = [xpad[:, :, dh:dh + H, dw:dw + W]                # (N, C, H, W) each
            for dh in range(KH) for dw in range(KW)]
    patches = (jnp.stack(taps, axis=2)                      # (N, C, KH*KW, H, W)
               .transpose(1, 2, 0, 3, 4)                    # (C, KH*KW, N, H, W)
               .reshape(K, NHW))                            # (K, N*HW)

    out2d = pl.pallas_call(
        _fused_kernel,
        out_shape=jax.ShapeDtypeStruct((O_total, NHW), jnp.float32),
        grid=(1,),                                          # single step: batch is in lanes
        in_specs=[
            pl.BlockSpec((K, NHW), lambda i: (0, 0)),
            pl.BlockSpec((O_total, K), lambda i: (0, 0)),
            pl.BlockSpec((O_total, 1), lambda i: (0, 0)),
        ],
        out_specs=pl.BlockSpec((O_total, NHW), lambda i: (0, 0)),
        compiler_params=pltpu.CompilerParams(
            # No batch grid axis any more; "parallel" sharding only pays off
            # for large N (reintroduce a batch axis then).
            dimension_semantics=("arbitrary",)),
    )(patches, w_mat, b_mat)

    # (O_total, N*HW) -> (N, O_total, H, W); tiny XLA transpose on ~16 KB.
    return out2d.reshape(O_total, N, H, W).transpose(1, 0, 2, 3)


# ----------------------------------------------------------------------------
# Plain-JAX reference (per-branch, mirrors the PyTorch module exactly).
# ----------------------------------------------------------------------------
def _reference_branch(x, w, b):
    O, C, KH, KW = w.shape
    ph, pw = (KH - 1) // 2, (KW - 1) // 2
    xpad = jnp.pad(x, ((0, 0), (0, 0), (ph, ph), (pw, pw)), mode="reflect")
    out = lax.conv_general_dilated(
        xpad, jnp.clip(w, -1.0, 1.0),
        window_strides=(1, 1), padding="VALID",
        dimension_numbers=("NCHW", "OIHW", "NCHW"))
    return out + b.reshape(1, O, 1, 1)


def _reference(x, params):
    return jnp.concatenate([_reference_branch(x, w, b) for (w, b) in params],
                           axis=-3)


if __name__ == "__main__":
    # Module config: in_channels=4, out_channels=[2,3,3], kernels (1,1)/(3,3)/(5,5)
    in_channels = 4
    out_channels = [2, 3, 3]
    kernels = [(1, 1), (3, 3), (5, 5)]

    key = jax.random.PRNGKey(0)
    kx, *kp = jax.random.split(key, 1 + 2 * len(kernels))

    x = jax.random.normal(kx, (2, in_channels, 16, 16), dtype=jnp.float32)

    params = []
    for i, ((kh, kw), oc) in enumerate(zip(kernels, out_channels)):
        kw_key, kb_key = kp[2 * i], kp[2 * i + 1]
        # Scale beyond [-1, 1] so the in-kernel clamp is actually exercised.
        w = 2.0 * jax.random.normal(kw_key, (oc, in_channels, kh, kw),
                                    dtype=jnp.float32)
        b = 0.1 * jax.random.normal(kb_key, (oc,), dtype=jnp.float32)
        params.append((w, b))

    out = jax.block_until_ready(ted_conv2d(x, params))
    ref = jax.block_until_ready(_reference(x, params))

    assert out.shape == (2, sum(out_channels), 16, 16), out.shape
    assert jnp.allclose(out, ref, atol=1e-4, rtol=1e-4), "mismatch vs reference"

    print("KERNEL_OK")
</pallas_src>

<mosaic_0001>
module attributes {stable_mosaic.version = 11 : i64} {
  func.func @_fused_kernel(%arg0: i32, %arg1: memref<100x512xf32, #tpu.memory_space<vmem>>, %arg2: memref<8x100xf32, #tpu.memory_space<vmem>>, %arg3: memref<8x1xf32, #tpu.memory_space<vmem>>, %arg4: memref<8x512xf32, #tpu.memory_space<vmem>>) attributes {dimension_semantics = [#tpu.dimension_semantics<arbitrary>], iteration_bounds = array<i64: 1>, scalar_prefetch = 0 : i64, scratch_operands = 0 : i64, tpu.core_type = #tpu.core_type<tc>, window_params = [{pipeline_mode = #tpu.pipeline_mode<synchronous>, transform_indices = @transform_0, window_bounds = array<i64: 100, 512>}, {pipeline_mode = #tpu.pipeline_mode<synchronous>, transform_indices = @transform_1, window_bounds = array<i64: 8, 100>}, {pipeline_mode = #tpu.pipeline_mode<synchronous>, transform_indices = @transform_2, window_bounds = array<i64: 8, 1>}, {pipeline_mode = #tpu.pipeline_mode<synchronous>, transform_indices = @transform_3, window_bounds = array<i64: 8, 512>}]} {
    %c0 = arith.constant 0 : index
    %c0_0 = arith.constant 0 : index
    %0 = vector.load %arg2[%c0, %c0_0] : memref<8x100xf32, #tpu.memory_space<vmem>>, vector<8x100xf32>
    %cst = arith.constant -1.000000e+00 : f32
    %cst_1 = arith.constant 1.000000e+00 : f32
    %1 = vector.broadcast %cst : f32 to vector<8x100xf32>
    %2 = arith.maximumf %1, %0 : vector<8x100xf32>
    %3 = vector.broadcast %cst_1 : f32 to vector<8x100xf32>
    %4 = arith.minimumf %3, %2 : vector<8x100xf32>
    %c0_2 = arith.constant 0 : index
    %c0_3 = arith.constant 0 : index
    %5 = vector.load %arg1[%c0_2, %c0_3] : memref<100x512xf32, #tpu.memory_space<vmem>>, vector<100x512xf32>
    %cst_4 = arith.constant dense<0.000000e+00> : vector<8x512xf32>
    %6 = tpu.matmul %4, %5, %cst_4 {dimension_numbers = #tpu.dot_dimension_numbers<[1], [0], [0], [1], [0, 0, 1, 1], [], []>} : vector<8x100xf32>, vector<100x512xf32>, vector<8x512xf32> -> vector<8x512xf32>
    %c0_5 = arith.constant 0 : index
    %c0_6 = arith.constant 0 : index
    %7 = vector.load %arg3[%c0_5, %c0_6] : memref<8x1xf32, #tpu.memory_space<vmem>>, vector<8x1xf32>
    %8 = vector.broadcast %7 : vector<8x1xf32> to vector<8x512xf32>
    %9 = arith.addf %6, %8 : vector<8x512xf32>
    %c0_7 = arith.constant 0 : index
    %c0_8 = arith.constant 0 : index
    %10 = vector.load %arg4[%c0_7, %c0_8] : memref<8x512xf32, #tpu.memory_space<vmem>>, vector<8x512xf32>
    tpu.vector_store %arg4[%c0_7, %c0_8], %9 {strides = array<i32>} : memref<8x512xf32, #tpu.memory_space<vmem>>, vector<8x512xf32>,
    return
  }
  func.func @transform_0(%arg0: i32) -> (i32, i32) {
    %c0_i32 = arith.constant 0 : i32
    %c0_i32_0 = arith.constant 0 : i32
    %c0_i32_1 = arith.constant 0 : i32
    return %c0_i32, %c0_i32_0 : i32, i32
  }
  func.func @transform_1(%arg0: i32) -> (i32, i32) {
    %c0_i32 = arith.constant 0 : i32
    %c0_i32_0 = arith.constant 0 : i32
    %c0_i32_1 = arith.constant 0 : i32
    return %c0_i32, %c0_i32_0 : i32, i32
  }
  func.func @transform_2(%arg0: i32) -> (i32, i32) {
    %c0_i32 = arith.constant 0 : i32
    %c0_i32_0 = arith.constant 0 : i32
    %c0_i32_1 = arith.constant 0 : i32
    return %c0_i32, %c0_i32_0 : i32, i32
  }
  func.func @transform_3(%arg0: i32) -> (i32, i32) {
    %c0_i32 = arith.constant 0 : i32
    %c0_i32_0 = arith.constant 0 : i32
    %c0_i32_1 = arith.constant 0 : i32
    return %c0_i32, %c0_i32_0 : i32, i32
  }
}

</mosaic_0001>

<bundles_post_ra>
// kernel: tpu_custom_call.1
= control target key start
LH: loop header
LB: loop body
LE: loop exit
PB: predicated region body
PF: predicated region fallthrough
CT: control target
= control target key end

     0   :  { %8 = vsyncpa [#allocation3], 0  ;;  %s434_s0 = inlined_call_operand.hbm [shape: f32[100,512], index: 0, kind: input, shape index: {}]   ;;  %s435_s1 = inlined_call_operand.vmem [shape: f32[8,100], index: 1, kind: input, shape index: {}]   ;;  %s436_s2 = inlined_call_operand.vmem [shape: f32[8,1], index: 2, kind: input, shape index: {}]   ;;  %s437_s3 = inlined_call_operand.hbm [shape: f32[8,512], index: 3, kind: output, shape index: {}]  }
   0x1   :  { %9 = vsyncpa [#allocation4], 0  ;;  %s378_s12 = smov [#allocation2]   ;;  %s330_s16 = scalar_lea.hbm %s434_s0, 6656 }
   0x2   :  { %s15_s13 = sshll.u32 %s378_s12, 4  ;;  %p331_p0 = scmp.ne.s32.totalorder %s434_s0, %s330_s16  ;;  %s16_s13 = int_to_ptr.vmem [resolvable:$true] %s15_s13 }
   0x3   :  { %p334_p1 = scmp.lt.u32.totalorder %s330_s16, %s434_s0 }
   0x5   :  { %p336_p2 = pnand %p334_p1, %p331_p0 }
   0x7   :  { %339 = shalt.err (!%p336_p2)
}
   0x8   :  { %s340_s21 = scalar_lea.vmem %s16_s13, 6656  ;;  %p345_p4 = scmp.lt.s32.totalorder %s16_s13, %s16_s13 }
   0x9   :  { %p341_p3 = scmp.ne.s32.totalorder %s16_s13, %s340_s21  ;;  %p346_p5 = scmp.lt.s32.totalorder %s340_s21, %s340_s21 }
   0xb   :  { %p347_p6 = por %p346_p5, %p345_p4 }
   0xd   :  { %p348_p7 = pnand %p347_p6, %p341_p3 }
   0xf   :  { %351 = shalt.err (!%p348_p7)
}
  0x10   :  { %s379_s22 = smov 512   ;;  %s380_s23 = smov 32  }
  0x11   :  { %21 = dma.hbm_to_vmem [thread:$0]  %s434_s0, 6656, %s16_s13, [#allocation3], %s379_s22, %s379_s22, %s380_s23  }
  0x12   :  { %374 = dma.done.wait [#allocation3], 6656  }
  0x13   :  { %375 = vsyncadd [#allocation3], 4294960640  ;;  %v381_v0 = vmov 0.0   ;;  %v382_v1 = vmov 0   ;;  %v33_v2 = vld [vmem:[#allocation2 + $0x8] sm:$0xff]  ;;  %v35_v4 = vld [vmem:[#allocation2 + $0x18] sm:$0xff] }
  0x14   :  { %171 = vmatprep.mubr.f32.mxu0 %v381_v0  ;;  %242 = vmatprep.mubr.f32.mxu1 %v381_v0  ;;  %v37_v3 = vld [vmem:[#allocation2 + $0x28] sm:$0xff]  ;;  %v39_v6 = vld [vmem:[#allocation2 + $0x38] sm:$0xff]  ;;  %v32_v7 = vld [vmem:[#allocation2] sm:$0xff]  ;;  %vm94_vm0 = vcmask 1043456   ;;  %vm90_vm1 = vcmask 818176  }
  0x15   :  { %329 = vset.pattern.permute.xlu0 %v382_v1  ;;  %v275_v5 = vpack.c.bf16 %v37_v3, %v33_v2  ;;  %v36_v8 = vld [vmem:[#allocation2 + $0x20] sm:$0xff]  ;;  %v299_v9 = vpack.c.bf16 %v39_v6, %v35_v4  ;;  %v34_v11 = vld [vmem:[#allocation2 + $0x10] sm:$0xff]  ;;  %v41_v13 = vld [vmem:[#allocation2 + $0x48] sm:$0xff] }
  0x16   :  { %v277_v10 = vpack.c.bf16 %v36_v8, %v32_v7  ;;  %v38_v12 = vld [vmem:[#allocation2 + $0x30] sm:$0xff]  ;;  %v45_v15 = vld [vmem:[#allocation2 + $0x68] sm:$0xff]  ;;  %v43_v16 = vld [vmem:[#allocation2 + $0x58] sm:$0xff] }
  0x17   :  { %276 = vmatprep.subr.bf16.mxu0 %v275_v5  ;;  %v301_v14 = vpack.c.bf16 %v38_v12, %v34_v11  ;;  %v47_v17 = vld [vmem:[#allocation2 + $0x78] sm:$0xff]  ;;  %300 = vmatprep.subr.bf16.mxu1 %v299_v9  ;;  %v279_v18 = vpack.c.bf16 %v45_v15, %v41_v13  ;;  %v40_v20 = vld [vmem:[#allocation2 + $0x40] sm:$0xff]  ;;  %v42_v22 = vld [vmem:[#allocation2 + $0x50] sm:$0xff] }
  0x18   :  { %278 = vmatpush1.bf16.msra.mxu0 %v277_v10  ;;  %v303_v19 = vpack.c.bf16 %v47_v17, %v43_v16  ;;  %v44_v21 = vld [vmem:[#allocation2 + $0x60] sm:$0xff]  ;;  %v46_v24 = vld [vmem:[#allocation2 + $0x70] sm:$0xff]  ;;  %v49_v25 = vld [vmem:[#allocation2 + $0x88] sm:$0xff] }
  0x19   :  { %302 = vmatpush1.bf16.msra.mxu1 %v301_v14  ;;  %v281_v23 = vpack.c.bf16 %v44_v21, %v40_v20  ;;  %v53_v26 = vld [vmem:[#allocation2 + $0xa8] sm:$0xff]  ;;  %280 = vmatprep.subr.bf16.mxu0 %v279_v18  ;;  %v305_v27 = vpack.c.bf16 %v46_v24, %v42_v22  ;;  %v51_v29 = vld [vmem:[#allocation2 + $0x98] sm:$0xff]  ;;  %v48_v31 = vld [vmem:[#allocation2 + $0x80] sm:$0xff] }
  0x1a   :  { %304 = vmatprep.subr.bf16.mxu1 %v303_v19  ;;  %v283_v28 = vpack.c.bf16 %v53_v26, %v49_v25  ;;  %v55_v30 = vld [vmem:[#allocation2 + $0xb8] sm:$0xff]  ;;  %v52_v33 = vld [vmem:[#allocation2 + $0xa0] sm:$0xff]  ;;  %v50_v34 = vld [vmem:[#allocation2 + $0x90] sm:$0xff] }
  0x1b   :  { %v307_v32 = vpack.c.bf16 %v55_v30, %v51_v29  ;;  %v54_v35 = vld [vmem:[#allocation2 + $0xb0] sm:$0xff]  ;;  %v285_v36 = vpack.c.bf16 %v52_v33, %v48_v31  ;;  %v57_v37 = vld [vmem:[#allocation2 + $0xc8] sm:$0xff]  ;;  %v59_v39 = vld [vmem:[#allocation2 + $0xd8] sm:$0xff] }
  0x1c   :  { %282 = vmatpush1.bf16.msra.mxu0 %v281_v23  ;;  %v61_v38 = vld [vmem:[#allocation2 + $0xe8] sm:$0xff]  ;;  %v309_v40 = vpack.c.bf16 %v54_v35, %v50_v34  ;;  %v63_v42 = vld [vmem:[#allocation2 + $0xf8] sm:$0xff]  ;;  %v56_v43 = vld [vmem:[#allocation2 + $0xc0] sm:$0xff] }
  0x1d   :  { %306 = vmatpush1.bf16.msra.mxu1 %v305_v27  ;;  %284 = vmatprep.subr.bf16.mxu0 %v283_v28  ;;  %v287_v41 = vpack.c.bf16 %v61_v38, %v57_v37  ;;  %v60_v44 = vld [vmem:[#allocation2 + $0xe0] sm:$0xff]  ;;  %v311_v45 = vpack.c.bf16 %v63_v42, %v59_v39  ;;  %v58_v46 = vld [vmem:[#allocation2 + $0xd0] sm:$0xff]  ;;  %v65_v48 = vld [vmem:[#allocation2 + $0x108] sm:$0xff] }
  0x1e   :  { %308 = vmatprep.subr.bf16.mxu1 %v307_v32  ;;  %v62_v47 = vld [vmem:[#allocation2 + $0xf0] sm:$0xff]  ;;  %v69_v49 = vld [vmem:[#allocation2 + $0x128] sm:$0xff]  ;;  %v67_v50 = vld [vmem:[#allocation2 + $0x118] sm:$0xff]  ;;  %v289_v52 = vpack.c.bf16 %v60_v44, %v56_v43 }
  0x1f   :  { %v71_v51 = vld [vmem:[#allocation2 + $0x138] sm:$0xff]  ;;  %v313_v53 = vpack.c.bf16 %v62_v47, %v58_v46  ;;  %v291_v54 = vpack.c.bf16 %v69_v49, %v65_v48  ;;  %v64_v55 = vld [vmem:[#allocation2 + $0x100] sm:$0xff]  ;;  %v66_v57 = vld [vmem:[#allocation2 + $0x110] sm:$0xff] }
  0x20   :  { %286 = vmatpush1.bf16.msra.mxu0 %v285_v36  ;;  %v68_v56 = vld [vmem:[#allocation2 + $0x120] sm:$0xff]  ;;  %v315_v58 = vpack.c.bf16 %v71_v51, %v67_v50  ;;  %v70_v59 = vld [vmem:[#allocation2 + $0x130] sm:$0xff]  ;;  %v73_v60 = vld [vmem:[#allocation2 + $0x148] sm:$0xff] }
  0x21   :  { %310 = vmatpush1.bf16.msra.mxu1 %v309_v40  ;;  %288 = vmatprep.subr.bf16.mxu0 %v287_v41  ;;  %v77_v61 = vld [vmem:[#allocation2 + $0x168] sm:$0xff]  ;;  %v75_v62 = vld [vmem:[#allocation2 + $0x158] sm:$0xff]  ;;  %v293_v0 = vpack.c.bf16 %v68_v56, %v64_v55  ;;  %v317_v1 = vpack.c.bf16 %v70_v59, %v66_v57  ;;  %v72_v3 = vld [vmem:[#allocation2 + $0x140] sm:$0xff] }
  0x22   :  { %312 = vmatprep.subr.bf16.mxu1 %v311_v45  ;;  %v79_v63 = vld [vmem:[#allocation2 + $0x178] sm:$0xff]  ;;  %v295_v2 = vpack.c.bf16 %v77_v61, %v73_v60  ;;  %v76_v4 = vld [vmem:[#allocation2 + $0x160] sm:$0xff]  ;;  %v74_v7 = vld [vmem:[#allocation2 + $0x150] sm:$0xff] }
  0x23   :  { %v84_v5 = vld [vmem:[%s436_s2] sm:$0xff]  ;;  %v319_v6 = vpack.c.bf16 %v79_v63, %v75_v62  ;;  %v78_v8 = vld [vmem:[#allocation2 + $0x170] sm:$0xff]  ;;  %v297_v9 = vpack.c.bf16 %v76_v4, %v72_v3  ;;  %v81_v11 = vld [vmem:[#allocation2 + $0x188] sm:$0xf]  ;;  %s383_s2 = smov [#allocation5]  }
  0x24   :  { %290 = vmatpush1.bf16.msra.mxu0 %v289_v52  ;;  %87 = vperm.xlu0 %329, %v84_v5   ;;  %v321_v10 = vpack.c.bf16 %v78_v8, %v74_v7  ;;  %v29_v12 = vld [vmem:[%s435_s1] sm:$0xff]  ;;  %v83_v13 = vld [vmem:[#allocation2 + $0x198] sm:$0xf]  ;;  %v82_v16 = vld [vmem:[#allocation2 + $0x190] sm:$0xf]  ;;  %s259_s29 = sshll.u32 %s383_s2, 4  ;;  %s260_s29 = int_to_ptr.vmem [resolvable:$true] %s259_s29 }
  0x25   :  { %314 = vmatpush1.bf16.msra.mxu1 %v313_v53  ;;  %292 = vmatprep.subr.bf16.mxu0 %v291_v54  ;;  %v80_v14 = vld [vmem:[#allocation2 + $0x180] sm:$0xf]  ;;  %v268_v15 = vclamps-f32 %v29_v12, 1.0  ;;  %s352_s1 = scalar_lea.vmem %s260_s29, 512  ;;  %p357_p9 = scmp.lt.s32.totalorder %s260_s29, %s260_s29 }
  0x26   :  { %316 = vmatprep.subr.bf16.mxu1 %v315_v58  ;;  %p353_p8 = scmp.ne.s32.totalorder %s260_s29, %s352_s1  ;;  %p358_p10 = scmp.lt.s32.totalorder %s352_s1, %s352_s1 }
  0x28   :  { %294 = vmatpush1.bf16.msra.mxu0 %v293_v0  ;;  %p359_p11 = por %p358_p10, %p357_p9 }
  0x29   :  { %318 = vmatpush1.bf16.msra.mxu1 %v317_v1  ;;  %296 = vmatprep.subr.bf16.mxu0 %v295_v2 }
  0x2a   :  { %320 = vmatprep.subr.bf16.mxu1 %v319_v6  ;;  %p360_p12 = pnand %p359_p11, %p353_p8 }
  0x2c   :  { %298 = vmatpush1.bf16.msra.mxu0 %v297_v9 }
  0x2d   :  { %322 = vmatpush1.bf16.msra.mxu1 %v321_v10  ;;  %269 = vmatprep.subr.msk.mxu0 %vm94_vm0, %v81_v11 }
  0x2e   :  { %272 = vmatprep.subr.msk.mxu1 %vm94_vm0, %v83_v13 }
  0x30   :  { %270 = vmatpush1.msk.msra.mxu0 %vm94_vm0, %v80_v14 }
  0x31   :  { %273 = vmatpush1.msk.msra.mxu1 %vm94_vm0, %v82_v16  ;;  %271 = vmatmul.mubr.msk.f32.vlgmr.msra.gmra.mrb[0].mxu0 %vm90_vm1, %v268_v15 }
  0x32   :  { %274 = vmatmul.mubr.msk.f32.vlgmr.msra.gmra.mrb[0].mxu1 %vm90_vm1, %v268_v15 }
  0xa3   :  { %v88_v17 = vpop.permute.xlu0 %87 }
 0x104   :  { %v173_v18 = vpop.f32.mrb[0].mxu0 }
 0x105   :  { %v174_v19 = vadd.f32 %v173_v18, %v88_v17  ;;  %v244_v20 = vpop.f32.mrb[0].mxu1  ;;  %v175_v21 = vpop.f32.mrb[1].mxu0 }
 0x106   :  { %v245_v22 = vadd.f32 %v244_v20, %v88_v17  ;;  %v176_v23 = vadd.f32 %v175_v21, %v88_v17  ;;  %v246_v24 = vpop.f32.mrb[1].mxu1 }
 0x107   :  { %249 = vst [vmem:[#allocation5] sm:$0xff] %v174_v19  ;;  %v247_v25 = vadd.f32 %v246_v24, %v88_v17 }
 0x108   :  { %251 = vst [vmem:[#allocation5 + $0x10] sm:$0xff] %v245_v22  ;;  %250 = vst [vmem:[#allocation5 + $0x8] sm:$0xff] %v176_v23 }
 0x109   :  { %252 = vst [vmem:[#allocation5 + $0x18] sm:$0xff] %v247_v25 }
 0x10a   :  { %363 = shalt.err (!%p360_p12)
}
 0x10b   :  { %s364_s5 = scalar_lea.hbm %s437_s3, 512 }
 0x10c   :  { %p365_p13 = scmp.ne.s32.totalorder %s437_s3, %s364_s5  ;;  %p368_p0 = scmp.lt.u32.totalorder %s364_s5, %s437_s3 }
 0x10e   :  { %p370_p1 = pnand %p368_p0, %p365_p13 }
 0x110   :  { %373 = shalt.err (!%p370_p1)
}
 0x111   :  { %262 = dma.vmem_to_hbm [thread:$0]  %s260_s29, 512, %s437_s3, [#allocation4]  }
 0x112   :  { %376 = dma.done.wait [#allocation4], 512  }
 0x113   :  { %377 = vsyncadd [#allocation4], 4294966784 }
 0x114   :  { %266 = vsyncpa [#allocation3], 1 }
 0x115   :  { %267 = vsyncpa [#allocation4], 1 }

</bundles_post_ra>
